<compile_context>
chip_gen: v7x
topology: tpu7x:2x2x1
jax: 0.10.0
libtpu: 0.0.40
codegen_flags: <defaults>
</compile_context>

<pallas_src>
import math
from functools import partial

import jax
import jax.numpy as jnp
import numpy as np
from jax import lax
from jax.experimental import pallas as pl
from jax.experimental.pallas import tpu as pltpu


# ----------------------------- config (small, synthetic) -----------------------------
HIDDEN = 32
NUM_HEADS = 4
HEAD_DIM = HIDDEN // NUM_HEADS          # 8
NUM_KV_HEADS = 2
NUM_KV_GROUPS = NUM_HEADS // NUM_KV_HEADS
ROPE_THETA = 10000.0
BATCH = 2
SEQ = 8

Q_OUT = NUM_HEADS * HEAD_DIM            # 32
K_OUT = NUM_KV_HEADS * HEAD_DIM         # 16
V_OUT = NUM_KV_HEADS * HEAD_DIM         # 16
QK_OUT = Q_OUT + K_OUT                  # 48
QKV_OUT = Q_OUT + K_OUT + V_OUT         # 64


# ----------------------------- fused kernel -----------------------------
def _fused_attn_kernel(x_ref, wqkv_ref, wrot_ref, wo_ref, cos_ref, sin_ref, o_ref, *,
                       batch, seq, num_heads, num_kv_heads, head_dim):
    groups = num_heads // num_kv_heads
    q_out = num_heads * head_dim
    k_out = num_kv_heads * head_dim
    qk_out = q_out + k_out

    x = x_ref[...]                                                        # (B*S, hidden)

    # (1) two independent MXU matmuls from x: fused QKV projection and its rotate-half twin.
    #     (1/sqrt(head_dim) is already folded into the q columns of both weights.)
    qkv = jnp.dot(x, wqkv_ref[...], preferred_element_type=jnp.float32)     # (B*S, QKV_OUT)
    qk_rot = jnp.dot(x, wrot_ref[...], preferred_element_type=jnp.float32)  # (B*S, QK_OUT)

    # (2) RoPE on q/k lanes only, with compact cos/sin tiled across heads ONCE (hoisted).
    cos = cos_ref[...]                                                    # (B*S, head_dim)
    sin = sin_ref[...]
    n_rope_heads = num_heads + num_kv_heads
    cos_qk = jnp.concatenate([cos] * n_rope_heads, axis=-1)               # (B*S, QK_OUT)
    sin_qk = jnp.concatenate([sin] * n_rope_heads, axis=-1)
    qk = qkv[:, :qk_out] * cos_qk + qk_rot * sin_qk                       # (B*S, QK_OUT)
    v = qkv[:, qk_out:]                                                   # (B*S, V_OUT)

    # (3) per-batch, per-head GQA attention (tiny static unroll: B*H = 8 iterations).
    attn_rows = []
    for b in range(batch):
        r0 = b * seq
        head_outs = []
        for h in range(num_heads):
            g = h // groups                                               # GQA: shared kv head
            q_h = qk[r0:r0 + seq, h * head_dim:(h + 1) * head_dim]        # (S, D), pre-scaled
            k_h = qk[r0:r0 + seq, q_out + g * head_dim: q_out + (g + 1) * head_dim]
            v_h = v[r0:r0 + seq, g * head_dim:(g + 1) * head_dim]
            # q @ k^T without an explicit transpose: contract last dims on the MXU.
            s = lax.dot_general(q_h, k_h, (((1,), (1,)), ((), ())),
                                preferred_element_type=jnp.float32)       # (S, S)
            m = jnp.max(s, axis=-1, keepdims=True)
            e = jnp.exp(s - m)
            p = e * pl.reciprocal(jnp.sum(e, axis=-1, keepdims=True), approx=True)
            head_outs.append(jnp.dot(p, v_h, preferred_element_type=jnp.float32))
        attn_rows.append(jnp.concatenate(head_outs, axis=-1))             # (S, hidden)
    attn = jnp.concatenate(attn_rows, axis=0)                             # (B*S, hidden)

    # (4) single O-projection matmul for the whole batch.
    o_ref[...] = jnp.dot(attn, wo_ref[...],
                         preferred_element_type=jnp.float32).astype(o_ref.dtype)


# ----------------------------- one-time parameter preprocessing -----------------------------
def prepare_params(params):
    """Hoisted out of the forward: run ONCE at load time.
    Builds (in, out)-layout fused weights, the rotate-half twin of the q/k weight, and folds
    the 1/sqrt(head_dim) score scale into the q columns."""
    scale = 1.0 / math.sqrt(HEAD_DIM)
    wq = params["w_q"].T * scale                                          # (hid, Q_OUT)
    wk = params["w_k"].T                                                  # (hid, K_OUT)
    wv = params["w_v"].T                                                  # (hid, V_OUT)
    w_qkv = jnp.concatenate([wq, wk, wv], axis=1)                         # (hid, QKV_OUT)

    half = HEAD_DIM // 2

    def rot_cols(w):  # rotate_half applied to the output columns of each head block
        blocks = []
        for h in range(w.shape[1] // HEAD_DIM):
            blk = w[:, h * HEAD_DIM:(h + 1) * HEAD_DIM]
            blocks.append(jnp.concatenate([-blk[:, half:], blk[:, :half]], axis=1))
        return jnp.concatenate(blocks, axis=1)

    w_qk_rot = jnp.concatenate([rot_cols(wq), rot_cols(wk)], axis=1)      # (hid, QK_OUT)
    w_o = params["w_o"].T                                                 # (hid, hid)
    return {"w_qkv": w_qkv, "w_qk_rot": w_qk_rot, "w_o": w_o}


def rotary_cos_sin(position_ids, head_dim, base, dtype):
    # position_ids: (B, S) int32  ->  cos/sin (B, S, head_dim), matching LlamaRotaryEmbedding.
    inv_freq = 1.0 / (base ** (jnp.arange(0, head_dim, 2, dtype=jnp.float32) / head_dim))
    freqs = position_ids.astype(jnp.float32)[:, :, None] * inv_freq[None, None, :]
    emb = jnp.concatenate([freqs, freqs], axis=-1)
    return jnp.cos(emb).astype(dtype), jnp.sin(emb).astype(dtype)


# ----------------------------- full module forward (single pallas_call) -----------------------------
def llama_attention_forward(hidden_states, position_ids, prepared):
    """
    hidden_states: (B, S, HIDDEN) float32
    position_ids:  (B, S) int32
    prepared:      output of prepare_params() (weights pre-transposed/fused/scaled once).
    """
    B, S, hid = hidden_states.shape
    dtype = hidden_states.dtype
    BS = B * S

    x_flat = hidden_states.reshape(BS, hid)
    # compact cos/sin: (B*S, head_dim) — no (B,S,QKV_OUT) materialization.
    cos, sin = rotary_cos_sin(position_ids, HEAD_DIM, ROPE_THETA, dtype)
    cos = cos.reshape(BS, HEAD_DIM)
    sin = sin.reshape(BS, HEAD_DIM)

    kernel = partial(_fused_attn_kernel, batch=B, seq=S, num_heads=NUM_HEADS,
                     num_kv_heads=NUM_KV_HEADS, head_dim=HEAD_DIM)

    out_flat = pl.pallas_call(
        kernel,
        out_shape=jax.ShapeDtypeStruct((BS, hid), dtype),
        grid=(1,),                                                        # single step: whole problem fits VMEM
        in_specs=[
            pl.BlockSpec((BS, hid), lambda i: (0, 0)),                    # hidden_states (flattened)
            pl.BlockSpec((hid, QKV_OUT), lambda i: (0, 0)),               # fused QKV weight (q pre-scaled)
            pl.BlockSpec((hid, QK_OUT), lambda i: (0, 0)),                # rotate_half(W_qk) twin
            pl.BlockSpec((hid, hid), lambda i: (0, 0)),                   # O weight
            pl.BlockSpec((BS, HEAD_DIM), lambda i: (0, 0)),               # cos (compact)
            pl.BlockSpec((BS, HEAD_DIM), lambda i: (0, 0)),               # sin (compact)
        ],
        out_specs=pl.BlockSpec((BS, hid), lambda i: (0, 0)),              # NOTE: real hidden sizes (multiple of 128) give unmasked lane-dense stores
        compiler_params=pltpu.CompilerParams(dimension_semantics=("arbitrary",)),
    )(x_flat, prepared["w_qkv"], prepared["w_qk_rot"], prepared["w_o"], cos, sin)

    return out_flat.reshape(B, S, hid)


# ----------------------------- pure-JAX reference (mirrors the PyTorch forward) -----------------------------
def reference_forward(hidden_states, position_ids, params):
    B, S, hid = hidden_states.shape
    q = hidden_states @ params["w_q"].T
    k = hidden_states @ params["w_k"].T
    v = hidden_states @ params["w_v"].T
    q = q.reshape(B, S, NUM_HEADS, HEAD_DIM).transpose(0, 2, 1, 3)
    k = k.reshape(B, S, NUM_KV_HEADS, HEAD_DIM).transpose(0, 2, 1, 3)
    v = v.reshape(B, S, NUM_KV_HEADS, HEAD_DIM).transpose(0, 2, 1, 3)
    cos, sin = rotary_cos_sin(position_ids, HEAD_DIM, ROPE_THETA, hidden_states.dtype)
    cos = cos[:, None, :, :]
    sin = sin[:, None, :, :]

    def rot_half(x):
        x1, x2 = x[..., : HEAD_DIM // 2], x[..., HEAD_DIM // 2:]
        return jnp.concatenate([-x2, x1], axis=-1)

    q = q * cos + rot_half(q) * sin
    k = k * cos + rot_half(k) * sin
    k = jnp.repeat(k, NUM_KV_GROUPS, axis=1)
    v = jnp.repeat(v, NUM_KV_GROUPS, axis=1)
    scores = jnp.einsum("bhqd,bhkd->bhqk", q, k) / math.sqrt(HEAD_DIM)
    p = jax.nn.softmax(scores, axis=-1)
    attn = jnp.einsum("bhqk,bhkd->bhqd", p, v)
    attn = attn.transpose(0, 2, 1, 3).reshape(B, S, hid)
    return attn @ params["w_o"].T


# ----------------------------- main -----------------------------
if __name__ == "__main__":
    key = jax.random.PRNGKey(0)
    k_x, k_q, k_k, k_v, k_o = jax.random.split(key, 5)

    hidden_states = jax.random.normal(k_x, (BATCH, SEQ, HIDDEN), dtype=jnp.float32)
    position_ids = jnp.broadcast_to(jnp.arange(SEQ, dtype=jnp.int32)[None, :], (BATCH, SEQ))

    # deterministic weights, torch nn.Linear layout (out_features, in_features), no bias
    scale = 1.0 / math.sqrt(HIDDEN)
    params = {
        "w_q": jax.random.normal(k_q, (NUM_HEADS * HEAD_DIM, HIDDEN), jnp.float32) * scale,
        "w_k": jax.random.normal(k_k, (NUM_KV_HEADS * HEAD_DIM, HIDDEN), jnp.float32) * scale,
        "w_v": jax.random.normal(k_v, (NUM_KV_HEADS * HEAD_DIM, HIDDEN), jnp.float32) * scale,
        "w_o": jax.random.normal(k_o, (HIDDEN, HIDDEN), jnp.float32) * scale,
    }

    # One-time weight preprocessing (hoisted out of the forward path).
    prepared = jax.tree.map(jax.block_until_ready, prepare_params(params))

    fwd = jax.jit(llama_attention_forward)
    out = fwd(hidden_states, position_ids, prepared)
    out = jax.block_until_ready(out)

    ref = reference_forward(hidden_states, position_ids, params)
    # tolerance accounts for pl.reciprocal(approx=True) in the softmax denominator
    np.testing.assert_allclose(np.asarray(out), np.asarray(ref), rtol=2e-3, atol=2e-3)

    print("KERNEL_OK")
</pallas_src>

<mosaic_0001>
module attributes {stable_mosaic.version = 11 : i64} {
  func.func @_fused_attn_kernel(%arg0: i32, %arg1: memref<16x32xf32, #tpu.memory_space<vmem>>, %arg2: memref<32x64xf32, #tpu.memory_space<vmem>>, %arg3: memref<32x48xf32, #tpu.memory_space<vmem>>, %arg4: memref<32x32xf32, #tpu.memory_space<vmem>>, %arg5: memref<16x8xf32, #tpu.memory_space<vmem>>, %arg6: memref<16x8xf32, #tpu.memory_space<vmem>>, %arg7: memref<16x32xf32, #tpu.memory_space<vmem>>) attributes {dimension_semantics = [#tpu.dimension_semantics<arbitrary>], iteration_bounds = array<i64: 1>, scalar_prefetch = 0 : i64, scratch_operands = 0 : i64, tpu.core_type = #tpu.core_type<tc>, window_params = [{pipeline_mode = #tpu.pipeline_mode<synchronous>, transform_indices = @transform_0, window_bounds = array<i64: 16, 32>}, {pipeline_mode = #tpu.pipeline_mode<synchronous>, transform_indices = @transform_1, window_bounds = array<i64: 32, 64>}, {pipeline_mode = #tpu.pipeline_mode<synchronous>, transform_indices = @transform_2, window_bounds = array<i64: 32, 48>}, {pipeline_mode = #tpu.pipeline_mode<synchronous>, transform_indices = @transform_3, window_bounds = array<i64: 32, 32>}, {pipeline_mode = #tpu.pipeline_mode<synchronous>, transform_indices = @transform_4, window_bounds = array<i64: 16, 8>}, {pipeline_mode = #tpu.pipeline_mode<synchronous>, transform_indices = @transform_5, window_bounds = array<i64: 16, 8>}, {pipeline_mode = #tpu.pipeline_mode<synchronous>, transform_indices = @transform_6, window_bounds = array<i64: 16, 32>}]} {
    %c0 = arith.constant 0 : index
    %c0_0 = arith.constant 0 : index
    %0 = vector.load %arg1[%c0, %c0_0] : memref<16x32xf32, #tpu.memory_space<vmem>>, vector<16x32xf32>
    %c0_1 = arith.constant 0 : index
    %c0_2 = arith.constant 0 : index
    %1 = vector.load %arg2[%c0_1, %c0_2] : memref<32x64xf32, #tpu.memory_space<vmem>>, vector<32x64xf32>
    %cst = arith.constant dense<0.000000e+00> : vector<16x64xf32>
    %2 = tpu.matmul %0, %1, %cst {dimension_numbers = #tpu.dot_dimension_numbers<[1], [0], [0], [1], [0, 0, 1, 1], [], []>} : vector<16x32xf32>, vector<32x64xf32>, vector<16x64xf32> -> vector<16x64xf32>
    %c0_3 = arith.constant 0 : index
    %c0_4 = arith.constant 0 : index
    %3 = vector.load %arg3[%c0_3, %c0_4] : memref<32x48xf32, #tpu.memory_space<vmem>>, vector<32x48xf32>
    %cst_5 = arith.constant dense<0.000000e+00> : vector<16x48xf32>
    %4 = tpu.matmul %0, %3, %cst_5 {dimension_numbers = #tpu.dot_dimension_numbers<[1], [0], [0], [1], [0, 0, 1, 1], [], []>} : vector<16x32xf32>, vector<32x48xf32>, vector<16x48xf32> -> vector<16x48xf32>
    %c0_6 = arith.constant 0 : index
    %c0_7 = arith.constant 0 : index
    %5 = vector.load %arg5[%c0_6, %c0_7] : memref<16x8xf32, #tpu.memory_space<vmem>>, vector<16x8xf32>
    %c0_8 = arith.constant 0 : index
    %c0_9 = arith.constant 0 : index
    %6 = vector.load %arg6[%c0_8, %c0_9] : memref<16x8xf32, #tpu.memory_space<vmem>>, vector<16x8xf32>
    %7 = tpu.concatenate %5, %5, %5, %5, %5, %5 in 1 : vector<16x8xf32>, vector<16x8xf32>, vector<16x8xf32>, vector<16x8xf32>, vector<16x8xf32>, vector<16x8xf32> -> vector<16x48xf32>
    %8 = tpu.concatenate %6, %6, %6, %6, %6, %6 in 1 : vector<16x8xf32>, vector<16x8xf32>, vector<16x8xf32>, vector<16x8xf32>, vector<16x8xf32>, vector<16x8xf32> -> vector<16x48xf32>
    %9 = vector.extract_strided_slice %2 {offsets = [0, 0], sizes = [16, 48], strides = [1, 1]} : vector<16x64xf32> to vector<16x48xf32>
    %10 = arith.mulf %9, %7 : vector<16x48xf32>
    %11 = arith.mulf %4, %8 : vector<16x48xf32>
    %12 = arith.addf %10, %11 : vector<16x48xf32>
    %13 = vector.extract_strided_slice %2 {offsets = [0, 48], sizes = [16, 16], strides = [1, 1]} : vector<16x64xf32> to vector<16x16xf32>
    %14 = vector.extract_strided_slice %12 {offsets = [0, 0], sizes = [8, 8], strides = [1, 1]} : vector<16x48xf32> to vector<8x8xf32>
    %15 = vector.extract_strided_slice %12 {offsets = [0, 32], sizes = [8, 8], strides = [1, 1]} : vector<16x48xf32> to vector<8x8xf32>
    %16 = vector.extract_strided_slice %13 {offsets = [0, 0], sizes = [8, 8], strides = [1, 1]} : vector<16x16xf32> to vector<8x8xf32>
    %cst_10 = arith.constant dense<0.000000e+00> : vector<8x8xf32>
    %17 = tpu.matmul %14, %15, %cst_10 {dimension_numbers = #tpu.dot_dimension_numbers<[1], [1], [0], [0], [0, 0, 1, 0], [], []>} : vector<8x8xf32>, vector<8x8xf32>, vector<8x8xf32> -> vector<8x8xf32>
    %cst_11 = arith.constant dense<0xFF800000> : vector<8xf32>
    %18 = vector.multi_reduction <maximumf>, %17, %cst_11 [1] : vector<8x8xf32> to vector<8xf32>
    %19 = vector.shape_cast %18 : vector<8xf32> to vector<8x1xf32>
    %20 = vector.broadcast %19 : vector<8x1xf32> to vector<8x8xf32>
    %21 = arith.subf %17, %20 : vector<8x8xf32>
    %22 = math.exp %21 : vector<8x8xf32>
    %cst_12 = arith.constant dense<0.000000e+00> : vector<8xf32>
    %23 = vector.multi_reduction <add>, %22, %cst_12 [1] : vector<8x8xf32> to vector<8xf32>
    %24 = vector.shape_cast %23 : vector<8xf32> to vector<8x1xf32>
    %25 = tpu.reciprocal %24 {approx = true} : vector<8x1xf32> -> vector<8x1xf32>
    %26 = vector.broadcast %25 : vector<8x1xf32> to vector<8x8xf32>
    %27 = arith.mulf %22, %26 : vector<8x8xf32>
    %cst_13 = arith.constant dense<0.000000e+00> : vector<8x8xf32>
    %28 = tpu.matmul %27, %16, %cst_13 {dimension_numbers = #tpu.dot_dimension_numbers<[1], [0], [0], [1], [0, 0, 1, 1], [], []>} : vector<8x8xf32>, vector<8x8xf32>, vector<8x8xf32> -> vector<8x8xf32>
    %29 = vector.extract_strided_slice %12 {offsets = [0, 8], sizes = [8, 8], strides = [1, 1]} : vector<16x48xf32> to vector<8x8xf32>
    %30 = vector.extract_strided_slice %12 {offsets = [0, 32], sizes = [8, 8], strides = [1, 1]} : vector<16x48xf32> to vector<8x8xf32>
    %31 = vector.extract_strided_slice %13 {offsets = [0, 0], sizes = [8, 8], strides = [1, 1]} : vector<16x16xf32> to vector<8x8xf32>
    %cst_14 = arith.constant dense<0.000000e+00> : vector<8x8xf32>
    %32 = tpu.matmul %29, %30, %cst_14 {dimension_numbers = #tpu.dot_dimension_numbers<[1], [1], [0], [0], [0, 0, 1, 0], [], []>} : vector<8x8xf32>, vector<8x8xf32>, vector<8x8xf32> -> vector<8x8xf32>
    %cst_15 = arith.constant dense<0xFF800000> : vector<8xf32>
    %33 = vector.multi_reduction <maximumf>, %32, %cst_15 [1] : vector<8x8xf32> to vector<8xf32>
    %34 = vector.shape_cast %33 : vector<8xf32> to vector<8x1xf32>
    %35 = vector.broadcast %34 : vector<8x1xf32> to vector<8x8xf32>
    %36 = arith.subf %32, %35 : vector<8x8xf32>
    %37 = math.exp %36 : vector<8x8xf32>
    %cst_16 = arith.constant dense<0.000000e+00> : vector<8xf32>
    %38 = vector.multi_reduction <add>, %37, %cst_16 [1] : vector<8x8xf32> to vector<8xf32>
    %39 = vector.shape_cast %38 : vector<8xf32> to vector<8x1xf32>
    %40 = tpu.reciprocal %39 {approx = true} : vector<8x1xf32> -> vector<8x1xf32>
    %41 = vector.broadcast %40 : vector<8x1xf32> to vector<8x8xf32>
    %42 = arith.mulf %37, %41 : vector<8x8xf32>
    %cst_17 = arith.constant dense<0.000000e+00> : vector<8x8xf32>
    %43 = tpu.matmul %42, %31, %cst_17 {dimension_numbers = #tpu.dot_dimension_numbers<[1], [0], [0], [1], [0, 0, 1, 1], [], []>} : vector<8x8xf32>, vector<8x8xf32>, vector<8x8xf32> -> vector<8x8xf32>
    %44 = vector.extract_strided_slice %12 {offsets = [0, 16], sizes = [8, 8], strides = [1, 1]} : vector<16x48xf32> to vector<8x8xf32>
    %45 = vector.extract_strided_slice %12 {offsets = [0, 40], sizes = [8, 8], strides = [1, 1]} : vector<16x48xf32> to vector<8x8xf32>
    %46 = vector.extract_strided_slice %13 {offsets = [0, 8], sizes = [8, 8], strides = [1, 1]} : vector<16x16xf32> to vector<8x8xf32>
    %cst_18 = arith.constant dense<0.000000e+00> : vector<8x8xf32>
    %47 = tpu.matmul %44, %45, %cst_18 {dimension_numbers = #tpu.dot_dimension_numbers<[1], [1], [0], [0], [0, 0, 1, 0], [], []>} : vector<8x8xf32>, vector<8x8xf32>, vector<8x8xf32> -> vector<8x8xf32>
    %cst_19 = arith.constant dense<0xFF800000> : vector<8xf32>
    %48 = vector.multi_reduction <maximumf>, %47, %cst_19 [1] : vector<8x8xf32> to vector<8xf32>
    %49 = vector.shape_cast %48 : vector<8xf32> to vector<8x1xf32>
    %50 = vector.broadcast %49 : vector<8x1xf32> to vector<8x8xf32>
    %51 = arith.subf %47, %50 : vector<8x8xf32>
    %52 = math.exp %51 : vector<8x8xf32>
    %cst_20 = arith.constant dense<0.000000e+00> : vector<8xf32>
    %53 = vector.multi_reduction <add>, %52, %cst_20 [1] : vector<8x8xf32> to vector<8xf32>
    %54 = vector.shape_cast %53 : vector<8xf32> to vector<8x1xf32>
    %55 = tpu.reciprocal %54 {approx = true} : vector<8x1xf32> -> vector<8x1xf32>
    %56 = vector.broadcast %55 : vector<8x1xf32> to vector<8x8xf32>
    %57 = arith.mulf %52, %56 : vector<8x8xf32>
    %cst_21 = arith.constant dense<0.000000e+00> : vector<8x8xf32>
    %58 = tpu.matmul %57, %46, %cst_21 {dimension_numbers = #tpu.dot_dimension_numbers<[1], [0], [0], [1], [0, 0, 1, 1], [], []>} : vector<8x8xf32>, vector<8x8xf32>, vector<8x8xf32> -> vector<8x8xf32>
    %59 = vector.extract_strided_slice %12 {offsets = [0, 24], sizes = [8, 8], strides = [1, 1]} : vector<16x48xf32> to vector<8x8xf32>
    %60 = vector.extract_strided_slice %12 {offsets = [0, 40], sizes = [8, 8], strides = [1, 1]} : vector<16x48xf32> to vector<8x8xf32>
    %61 = vector.extract_strided_slice %13 {offsets = [0, 8], sizes = [8, 8], strides = [1, 1]} : vector<16x16xf32> to vector<8x8xf32>
    %cst_22 = arith.constant dense<0.000000e+00> : vector<8x8xf32>
    %62 = tpu.matmul %59, %60, %cst_22 {dimension_numbers = #tpu.dot_dimension_numbers<[1], [1], [0], [0], [0, 0, 1, 0], [], []>} : vector<8x8xf32>, vector<8x8xf32>, vector<8x8xf32> -> vector<8x8xf32>
    %cst_23 = arith.constant dense<0xFF800000> : vector<8xf32>
    %63 = vector.multi_reduction <maximumf>, %62, %cst_23 [1] : vector<8x8xf32> to vector<8xf32>
    %64 = vector.shape_cast %63 : vector<8xf32> to vector<8x1xf32>
    %65 = vector.broadcast %64 : vector<8x1xf32> to vector<8x8xf32>
    %66 = arith.subf %62, %65 : vector<8x8xf32>
    %67 = math.exp %66 : vector<8x8xf32>
    %cst_24 = arith.constant dense<0.000000e+00> : vector<8xf32>
    %68 = vector.multi_reduction <add>, %67, %cst_24 [1] : vector<8x8xf32> to vector<8xf32>
    %69 = vector.shape_cast %68 : vector<8xf32> to vector<8x1xf32>
    %70 = tpu.reciprocal %69 {approx = true} : vector<8x1xf32> -> vector<8x1xf32>
    %71 = vector.broadcast %70 : vector<8x1xf32> to vector<8x8xf32>
    %72 = arith.mulf %67, %71 : vector<8x8xf32>
    %cst_25 = arith.constant dense<0.000000e+00> : vector<8x8xf32>
    %73 = tpu.matmul %72, %61, %cst_25 {dimension_numbers = #tpu.dot_dimension_numbers<[1], [0], [0], [1], [0, 0, 1, 1], [], []>} : vector<8x8xf32>, vector<8x8xf32>, vector<8x8xf32> -> vector<8x8xf32>
    %74 = tpu.concatenate %28, %43, %58, %73 in 1 : vector<8x8xf32>, vector<8x8xf32>, vector<8x8xf32>, vector<8x8xf32> -> vector<8x32xf32>
    %75 = vector.extract_strided_slice %12 {offsets = [8, 0], sizes = [8, 8], strides = [1, 1]} : vector<16x48xf32> to vector<8x8xf32>
    %76 = vector.extract_strided_slice %12 {offsets = [8, 32], sizes = [8, 8], strides = [1, 1]} : vector<16x48xf32> to vector<8x8xf32>
    %77 = vector.extract_strided_slice %13 {offsets = [8, 0], sizes = [8, 8], strides = [1, 1]} : vector<16x16xf32> to vector<8x8xf32>
    %cst_26 = arith.constant dense<0.000000e+00> : vector<8x8xf32>
    %78 = tpu.matmul %75, %76, %cst_26 {dimension_numbers = #tpu.dot_dimension_numbers<[1], [1], [0], [0], [0, 0, 1, 0], [], []>} : vector<8x8xf32>, vector<8x8xf32>, vector<8x8xf32> -> vector<8x8xf32>
    %cst_27 = arith.constant dense<0xFF800000> : vector<8xf32>
    %79 = vector.multi_reduction <maximumf>, %78, %cst_27 [1] : vector<8x8xf32> to vector<8xf32>
    %80 = vector.shape_cast %79 : vector<8xf32> to vector<8x1xf32>
    %81 = vector.broadcast %80 : vector<8x1xf32> to vector<8x8xf32>
    %82 = arith.subf %78, %81 : vector<8x8xf32>
    %83 = math.exp %82 : vector<8x8xf32>
    %cst_28 = arith.constant dense<0.000000e+00> : vector<8xf32>
    %84 = vector.multi_reduction <add>, %83, %cst_28 [1] : vector<8x8xf32> to vector<8xf32>
    %85 = vector.shape_cast %84 : vector<8xf32> to vector<8x1xf32>
    %86 = tpu.reciprocal %85 {approx = true} : vector<8x1xf32> -> vector<8x1xf32>
    %87 = vector.broadcast %86 : vector<8x1xf32> to vector<8x8xf32>
    %88 = arith.mulf %83, %87 : vector<8x8xf32>
    %cst_29 = arith.constant dense<0.000000e+00> : vector<8x8xf32>
    %89 = tpu.matmul %88, %77, %cst_29 {dimension_numbers = #tpu.dot_dimension_numbers<[1], [0], [0], [1], [0, 0, 1, 1], [], []>} : vector<8x8xf32>, vector<8x8xf32>, vector<8x8xf32> -> vector<8x8xf32>
    %90 = vector.extract_strided_slice %12 {offsets = [8, 8], sizes = [8, 8], strides = [1, 1]} : vector<16x48xf32> to vector<8x8xf32>
    %91 = vector.extract_strided_slice %12 {offsets = [8, 32], sizes = [8, 8], strides = [1, 1]} : vector<16x48xf32> to vector<8x8xf32>
    %92 = vector.extract_strided_slice %13 {offsets = [8, 0], sizes = [8, 8], strides = [1, 1]} : vector<16x16xf32> to vector<8x8xf32>
    %cst_30 = arith.constant dense<0.000000e+00> : vector<8x8xf32>
    %93 = tpu.matmul %90, %91, %cst_30 {dimension_numbers = #tpu.dot_dimension_numbers<[1], [1], [0], [0], [0, 0, 1, 0], [], []>} : vector<8x8xf32>, vector<8x8xf32>, vector<8x8xf32> -> vector<8x8xf32>
    %cst_31 = arith.constant dense<0xFF800000> : vector<8xf32>
    %94 = vector.multi_reduction <maximumf>, %93, %cst_31 [1] : vector<8x8xf32> to vector<8xf32>
    %95 = vector.shape_cast %94 : vector<8xf32> to vector<8x1xf32>
    %96 = vector.broadcast %95 : vector<8x1xf32> to vector<8x8xf32>
    %97 = arith.subf %93, %96 : vector<8x8xf32>
    %98 = math.exp %97 : vector<8x8xf32>
    %cst_32 = arith.constant dense<0.000000e+00> : vector<8xf32>
    %99 = vector.multi_reduction <add>, %98, %cst_32 [1] : vector<8x8xf32> to vector<8xf32>
    %100 = vector.shape_cast %99 : vector<8xf32> to vector<8x1xf32>
    %101 = tpu.reciprocal %100 {approx = true} : vector<8x1xf32> -> vector<8x1xf32>
    %102 = vector.broadcast %101 : vector<8x1xf32> to vector<8x8xf32>
    %103 = arith.mulf %98, %102 : vector<8x8xf32>
    %cst_33 = arith.constant dense<0.000000e+00> : vector<8x8xf32>
    %104 = tpu.matmul %103, %92, %cst_33 {dimension_numbers = #tpu.dot_dimension_numbers<[1], [0], [0], [1], [0, 0, 1, 1], [], []>} : vector<8x8xf32>, vector<8x8xf32>, vector<8x8xf32> -> vector<8x8xf32>
    %105 = vector.extract_strided_slice %12 {offsets = [8, 16], sizes = [8, 8], strides = [1, 1]} : vector<16x48xf32> to vector<8x8xf32>
    %106 = vector.extract_strided_slice %12 {offsets = [8, 40], sizes = [8, 8], strides = [1, 1]} : vector<16x48xf32> to vector<8x8xf32>
    %107 = vector.extract_strided_slice %13 {offsets = [8, 8], sizes = [8, 8], strides = [1, 1]} : vector<16x16xf32> to vector<8x8xf32>
    %cst_34 = arith.constant dense<0.000000e+00> : vector<8x8xf32>
    %108 = tpu.matmul %105, %106, %cst_34 {dimension_numbers = #tpu.dot_dimension_numbers<[1], [1], [0], [0], [0, 0, 1, 0], [], []>} : vector<8x8xf32>, vector<8x8xf32>, vector<8x8xf32> -> vector<8x8xf32>
    %cst_35 = arith.constant dense<0xFF800000> : vector<8xf32>
    %109 = vector.multi_reduction <maximumf>, %108, %cst_35 [1] : vector<8x8xf32> to vector<8xf32>
    %110 = vector.shape_cast %109 : vector<8xf32> to vector<8x1xf32>
    %111 = vector.broadcast %110 : vector<8x1xf32> to vector<8x8xf32>
    %112 = arith.subf %108, %111 : vector<8x8xf32>
    %113 = math.exp %112 : vector<8x8xf32>
    %cst_36 = arith.constant dense<0.000000e+00> : vector<8xf32>
    %114 = vector.multi_reduction <add>, %113, %cst_36 [1] : vector<8x8xf32> to vector<8xf32>
    %115 = vector.shape_cast %114 : vector<8xf32> to vector<8x1xf32>
    %116 = tpu.reciprocal %115 {approx = true} : vector<8x1xf32> -> vector<8x1xf32>
    %117 = vector.broadcast %116 : vector<8x1xf32> to vector<8x8xf32>
    %118 = arith.mulf %113, %117 : vector<8x8xf32>
    %cst_37 = arith.constant dense<0.000000e+00> : vector<8x8xf32>
    %119 = tpu.matmul %118, %107, %cst_37 {dimension_numbers = #tpu.dot_dimension_numbers<[1], [0], [0], [1], [0, 0, 1, 1], [], []>} : vector<8x8xf32>, vector<8x8xf32>, vector<8x8xf32> -> vector<8x8xf32>
    %120 = vector.extract_strided_slice %12 {offsets = [8, 24], sizes = [8, 8], strides = [1, 1]} : vector<16x48xf32> to vector<8x8xf32>
    %121 = vector.extract_strided_slice %12 {offsets = [8, 40], sizes = [8, 8], strides = [1, 1]} : vector<16x48xf32> to vector<8x8xf32>
    %122 = vector.extract_strided_slice %13 {offsets = [8, 8], sizes = [8, 8], strides = [1, 1]} : vector<16x16xf32> to vector<8x8xf32>
    %cst_38 = arith.constant dense<0.000000e+00> : vector<8x8xf32>
    %123 = tpu.matmul %120, %121, %cst_38 {dimension_numbers = #tpu.dot_dimension_numbers<[1], [1], [0], [0], [0, 0, 1, 0], [], []>} : vector<8x8xf32>, vector<8x8xf32>, vector<8x8xf32> -> vector<8x8xf32>
    %cst_39 = arith.constant dense<0xFF800000> : vector<8xf32>
    %124 = vector.multi_reduction <maximumf>, %123, %cst_39 [1] : vector<8x8xf32> to vector<8xf32>
    %125 = vector.shape_cast %124 : vector<8xf32> to vector<8x1xf32>
    %126 = vector.broadcast %125 : vector<8x1xf32> to vector<8x8xf32>
    %127 = arith.subf %123, %126 : vector<8x8xf32>
    %128 = math.exp %127 : vector<8x8xf32>
    %cst_40 = arith.constant dense<0.000000e+00> : vector<8xf32>
    %129 = vector.multi_reduction <add>, %128, %cst_40 [1] : vector<8x8xf32> to vector<8xf32>
    %130 = vector.shape_cast %129 : vector<8xf32> to vector<8x1xf32>
    %131 = tpu.reciprocal %130 {approx = true} : vector<8x1xf32> -> vector<8x1xf32>
    %132 = vector.broadcast %131 : vector<8x1xf32> to vector<8x8xf32>
    %133 = arith.mulf %128, %132 : vector<8x8xf32>
    %cst_41 = arith.constant dense<0.000000e+00> : vector<8x8xf32>
    %134 = tpu.matmul %133, %122, %cst_41 {dimension_numbers = #tpu.dot_dimension_numbers<[1], [0], [0], [1], [0, 0, 1, 1], [], []>} : vector<8x8xf32>, vector<8x8xf32>, vector<8x8xf32> -> vector<8x8xf32>
    %135 = tpu.concatenate %89, %104, %119, %134 in 1 : vector<8x8xf32>, vector<8x8xf32>, vector<8x8xf32>, vector<8x8xf32> -> vector<8x32xf32>
    %136 = tpu.concatenate %74, %135 in 0 : vector<8x32xf32>, vector<8x32xf32> -> vector<16x32xf32>
    %c0_42 = arith.constant 0 : index
    %c0_43 = arith.constant 0 : index
    %137 = vector.load %arg4[%c0_42, %c0_43] : memref<32x32xf32, #tpu.memory_space<vmem>>, vector<32x32xf32>
    %cst_44 = arith.constant dense<0.000000e+00> : vector<16x32xf32>
    %138 = tpu.matmul %136, %137, %cst_44 {dimension_numbers = #tpu.dot_dimension_numbers<[1], [0], [0], [1], [0, 0, 1, 1], [], []>} : vector<16x32xf32>, vector<32x32xf32>, vector<16x32xf32> -> vector<16x32xf32>
    %c0_45 = arith.constant 0 : index
    %c0_46 = arith.constant 0 : index
    %139 = vector.load %arg7[%c0_45, %c0_46] : memref<16x32xf32, #tpu.memory_space<vmem>>, vector<16x32xf32>
    tpu.vector_store %arg7[%c0_45, %c0_46], %138 {strides = array<i32>} : memref<16x32xf32, #tpu.memory_space<vmem>>, vector<16x32xf32>,
    return
  }
  func.func @transform_0(%arg0: i32) -> (i32, i32) {
    %c0_i32 = arith.constant 0 : i32
    %c0_i32_0 = arith.constant 0 : i32
    %c0_i32_1 = arith.constant 0 : i32
    return %c0_i32, %c0_i32_0 : i32, i32
  }
  func.func @transform_1(%arg0: i32) -> (i32, i32) {
    %c0_i32 = arith.constant 0 : i32
    %c0_i32_0 = arith.constant 0 : i32
    %c0_i32_1 = arith.constant 0 : i32
    return %c0_i32, %c0_i32_0 : i32, i32
  }
  func.func @transform_2(%arg0: i32) -> (i32, i32) {
    %c0_i32 = arith.constant 0 : i32
    %c0_i32_0 = arith.constant 0 : i32
    %c0_i32_1 = arith.constant 0 : i32
    return %c0_i32, %c0_i32_0 : i32, i32
  }
  func.func @transform_3(%arg0: i32) -> (i32, i32) {
    %c0_i32 = arith.constant 0 : i32
    %c0_i32_0 = arith.constant 0 : i32
    %c0_i32_1 = arith.constant 0 : i32
    return %c0_i32, %c0_i32_0 : i32, i32
  }
  func.func @transform_4(%arg0: i32) -> (i32, i32) {
    %c0_i32 = arith.constant 0 : i32
    %c0_i32_0 = arith.constant 0 : i32
    %c0_i32_1 = arith.constant 0 : i32
    return %c0_i32, %c0_i32_0 : i32, i32
  }
  func.func @transform_5(%arg0: i32) -> (i32, i32) {
    %c0_i32 = arith.constant 0 : i32
    %c0_i32_0 = arith.constant 0 : i32
    %c0_i32_1 = arith.constant 0 : i32
    return %c0_i32, %c0_i32_0 : i32, i32
  }
  func.func @transform_6(%arg0: i32) -> (i32, i32) {
    %c0_i32 = arith.constant 0 : i32
    %c0_i32_0 = arith.constant 0 : i32
    %c0_i32_1 = arith.constant 0 : i32
    return %c0_i32, %c0_i32_0 : i32, i32
  }
}

</mosaic_0001>

<bundles_post_ra>
// kernel: llama_attention_forward.1
= control target key start
LH: loop header
LB: loop body
LE: loop exit
PB: predicated region body
PF: predicated region fallthrough
CT: control target
= control target key end

     0   :  { %11 = vsyncpa [#allocation3], 0  ;;  %s2331_s0 = inlined_call_operand.hbm [shape: f32[16,32], index: 0, kind: input, shape index: {}]   ;;  %s2332_s1 = inlined_call_operand.vmem [shape: f32[32,64], index: 1, kind: input, shape index: {}]   ;;  %s2333_s2 = inlined_call_operand.vmem [shape: f32[32,48], index: 2, kind: input, shape index: {}]   ;;  %s2334_s3 = inlined_call_operand.vmem [shape: f32[32,32], index: 3, kind: input, shape index: {}]   ;;  %s2335_s4 = inlined_call_operand.vmem [shape: f32[16,8], index: 4, kind: input, shape index: {}]   ;;  %s2336_s5 = inlined_call_operand.vmem [shape: f32[16,8], index: 5, kind: input, shape index: {}]   ;;  %s2337_s6 = inlined_call_operand.hbm [shape: f32[16,32], index: 6, kind: output, shape index: {}]  }
   0x1   :  { %12 = vsyncpa [#allocation4], 0  ;;  %s2043_s21 = smov [#allocation2]   ;;  %s1995_s25 = scalar_lea.hbm %s2331_s0, 256 }
   0x2   :  { %s18_s22 = sshll.u32 %s2043_s21, 4  ;;  %p1996_p0 = scmp.ne.s32.totalorder %s2331_s0, %s1995_s25  ;;  %s19_s22 = int_to_ptr.vmem [resolvable:$true] %s18_s22 }
   0x3   :  { %p1999_p1 = scmp.lt.u32.totalorder %s1995_s25, %s2331_s0 }
   0x5   :  { %p2001_p2 = pnand %p1999_p1, %p1996_p0 }
   0x7   :  { %2004 = shalt.err (!%p2001_p2)
}
   0x8   :  { %s2005_s30 = scalar_lea.vmem %s19_s22, 256  ;;  %p2010_p4 = scmp.lt.s32.totalorder %s19_s22, %s19_s22 }
   0x9   :  { %p2006_p3 = scmp.ne.s32.totalorder %s19_s22, %s2005_s30  ;;  %p2011_p5 = scmp.lt.s32.totalorder %s2005_s30, %s2005_s30 }
   0xb   :  { %p2012_p6 = por %p2011_p5, %p2010_p4 }
   0xd   :  { %p2013_p7 = pnand %p2012_p6, %p2006_p3 }
   0xf   :  { %2016 = shalt.err (!%p2013_p7)
}
  0x10   :  { %s2044_s7 = smov 128   ;;  %s2045_s8 = smov 8  }
  0x11   :  { %24 = dma.hbm_to_vmem [thread:$0]  %s2331_s0, 256, %s19_s22, [#allocation3], %s2044_s7, %s2044_s7, %s2045_s8  }
  0x12   :  { %2039 = dma.done.wait [#allocation3], 256  }
  0x13   :  { %2040 = vsyncadd [#allocation3], 4294967040  ;;  %v40_v0 = vld [vmem:[%s2332_s1] sm:$0xff]  ;;  %v41_v1 = vld [vmem:[%s2332_s1 + $0x8] sm:$0xff]  ;;  %vm44_vm0 = vcmask 261120   ;;  %s2047_s29 = smov 24  }
  0x14   :  { %v126_v2 = vld [vmem:[%s2333_s2] sm:$0xff]  ;;  %v1922_v3 = vpack.c.bf16 %v41_v1, %v40_v0  ;;  %v127_v4 = vld [vmem:[%s2333_s2 + $0x8] sm:$0xff]  ;;  %v42_v5 = vld [vmem:[%s2332_s1 + $0x10] sm:$0xff]  ;;  %s2048_s30 = smov 32   ;;  %s2049_s9 = smov 40   ;;  %v2050_v18 = vmov 0.0  }
  0x15   :  { %v43_v6 = vld [vmem:[%s2332_s1 + $0x18] sm:$0xff]  ;;  %v1930_v7 = vpack.c.bf16 %v127_v4, %v126_v2  ;;  %v128_v9 = vld [vmem:[%s2333_s2 + $0x10] sm:$0xff]  ;;  %v38_v11 = vld [vmem:[#allocation2] sm:$0xff]  ;;  %s2046_s1 = smov 16   ;;  %vm241_vm1 = vcmask 64512   ;;  %vm244_vm2 = vcmask 130048  }
  0x16   :  { %v1926_v8 = vpack.c.bf16 %v43_v6, %v42_v5  ;;  %v129_v10 = vld [vmem:[%s2333_s2 + $0x18] sm:$0xff]  ;;  %1923 = vmatprep.subr.bf16.mxu0 %v1922_v3  ;;  %1817 = vmatprep.mubr.msk.f32.mxu0 %vm44_vm0, %v38_v11  ;;  %v205_v13 = vld [vmem:[%s2335_s4] sm:$0xff]  ;;  %v39_v14 = vld [vmem:[#allocation2 + $0x8] sm:$0xff]  ;;  %vm247_vm3 = vcmask 195584   ;;  %vm2051_vm4 = vmmov 0   ;;  %vm252_vm5 = vcmask 326656  }
  0x17   :  { %v1934_v12 = vpack.c.bf16 %v129_v10, %v128_v9  ;;  %1931 = vmatprep.subr.bf16.mxu1 %v1930_v7  ;;  %1925 = vmatpush3.bf16.msra.mxu0 %v1922_v3  ;;  %v207_v15 = vld [vmem:[%s2336_s5] sm:$0xff]  ;;  %v208_v16 = vld [vmem:[%s2336_s5 + $0x8] sm:$0xff]  ;;  %s2053_s5 = smov 96   ;;  %s2054_s14 = smov 112  }
  0x18   :  { %1933 = vmatpush3.bf16.msra.mxu1 %v1930_v7  ;;  %1927 = vmatprep.subr.bf16.mxu0 %v1926_v8  ;;  %v206_v17 = vld [vmem:[%s2335_s4 + $0x8] sm:$0xff]  ;;  %s2052_s4 = smov 120   ;;  %s2055_s15 = smov 88  }
  0x19   :  { %1935 = vmatprep.subr.bf16.mxu1 %v1934_v12  ;;  %1828 = vmatprep.mubr.msk.f32.mxu1 %vm44_vm0, %v38_v11  ;;  %s2056_s16 = smov 104   ;;  %s2057_s17 = smov 72  }
  0x1a   :  { %217 = vrot.lane.b32.xlu1 %v205_v13, %s2046_s1  ;;  %211 = vrot.lane.b32.xlu0 %v205_v13, %s2045_s8  ;;  %s2058_s18 = smov 80  }
  0x1b   :  { %1929 = vmatpush3.bf16.msra.mxu0 %v1926_v8 }
  0x1c   :  { %1937 = vmatpush3.bf16.msra.mxu1 %v1934_v12  ;;  %1841 = vmatprep.subr.mxu0 %v2050_v18 }
  0x1d   :  { %1831 = vmatprep.subr.mxu1 %v2050_v18 }
  0x1e   :  { %1818 = vmatmul.mubr.msk.f32.vlgmr.msra.gmra.mrb[0].mxu0 %vm44_vm0, %v39_v14  ;;  %263 = vrot.lane.b32.xlu1 %v207_v15, %s2046_s1 }
  0x1f   :  { %1829 = vmatmul.mubr.msk.f32.vlgmr.msra.gmra.mrb[0].mxu1 %vm44_vm0, %v39_v14  ;;  %257 = vrot.lane.b32.xlu0 %v207_v15, %s2045_s8 }
  0x20   :  { %1833 = vmatprep.mubr.msk.f32.mxu1 %vm2051_vm4, %v2050_v18  ;;  %1843 = vmatprep.mubr.msk.f32.mxu0 %vm2051_vm4, %v2050_v18 }
  0x22   :  { %269 = vrot.lane.b32.xlu1 %v207_v15, %s2047_s29 }
  0x23   :  { %223 = vrot.lane.b32.xlu0 %v205_v13, %s2047_s29 }
  0x26   :  { %275 = vrot.lane.b32.xlu1 %v207_v15, %s2048_s30 }
  0x27   :  { %229 = vrot.lane.b32.xlu0 %v205_v13, %s2048_s30 }
  0x2a   :  { %281 = vrot.lane.b32.xlu1 %v207_v15, %s2049_s9 }
  0x2b   :  { %235 = vrot.lane.b32.xlu0 %v205_v13, %s2049_s9 }
  0x2e   :  { %259 = vrot.lane.b32.xlu1 %v208_v16, %s2045_s8 }
  0x2f   :  { %213 = vrot.lane.b32.xlu0 %v206_v17, %s2045_s8 }
  0x32   :  { %265 = vrot.lane.b32.xlu1 %v208_v16, %s2046_s1 }
  0x33   :  { %219 = vrot.lane.b32.xlu0 %v206_v17, %s2046_s1 }
  0x36   :  { %271 = vrot.lane.b32.xlu1 %v208_v16, %s2047_s29 }
  0x37   :  { %225 = vrot.lane.b32.xlu0 %v206_v17, %s2047_s29 }
  0x3a   :  { %277 = vrot.lane.b32.xlu1 %v208_v16, %s2048_s30 }
  0x3b   :  { %231 = vrot.lane.b32.xlu0 %v206_v17, %s2048_s30 }
  0x3e   :  { %283 = vrot.lane.b32.xlu1 %v208_v16, %s2049_s9 }
  0x3f   :  { %237 = vrot.lane.b32.xlu0 %v206_v17, %s2049_s9 }
  0x8c   :  { %v212_v19 = vpop.permute.xlu0 %211  ;;  %v218_v20 = vpop.permute.xlu1 %217 }
  0x8d   :  { %v242_v37 = vsel %vm241_vm1, %v205_v13, %v212_v19 }
  0x8e   :  { %v245_v43 = vsel %vm244_vm2, %v242_v37, %v218_v20 }
  0x90   :  { %v264_v22 = vpop.permute.xlu1 %263 }
  0x91   :  { %v258_v21 = vpop.permute.xlu0 %257 }
  0x92   :  { %v287_v40 = vsel %vm241_vm1, %v207_v15, %v258_v21 }
  0x93   :  { %v289_v45 = vsel %vm244_vm2, %v287_v40, %v264_v22 }
  0x94   :  { %v270_v24 = vpop.permute.xlu1 %269 }
  0x95   :  { %v224_v23 = vpop.permute.xlu0 %223  ;;  %v291_v50 = vsel %vm247_vm3, %v289_v45, %v270_v24 }
  0x96   :  { %v248_v47 = vsel %vm247_vm3, %v245_v43, %v224_v23 }
  0x98   :  { %v276_v26 = vpop.permute.xlu1 %275 }
  0x99   :  { %v230_v25 = vpop.permute.xlu0 %229  ;;  %v293_v55 = vsel %vm44_vm0, %v291_v50, %v276_v26 }
  0x9a   :  { %v250_v53 = vsel %vm44_vm0, %v248_v47, %v230_v25 }
  0x9c   :  { %v282_v28 = vpop.permute.xlu1 %281 }
  0x9d   :  { %v236_v27 = vpop.permute.xlu0 %235  ;;  %v295_v1 = vsel %vm252_vm5, %v293_v55, %v282_v28 }
  0x9e   :  { %v253_v58 = vsel %vm252_vm5, %v250_v53, %v236_v27 }
  0xa0   :  { %v260_v30 = vpop.permute.xlu1 %259 }
  0xa1   :  { %v214_v29 = vpop.permute.xlu0 %213  ;;  %v288_v36 = vsel %vm241_vm1, %v208_v16, %v260_v30 }
  0xa2   :  { %v243_v35 = vsel %vm241_vm1, %v206_v17, %v214_v29 }
  0xa4   :  { %v266_v32 = vpop.permute.xlu1 %265 }
  0xa5   :  { %v220_v31 = vpop.permute.xlu0 %219  ;;  %v290_v41 = vsel %vm244_vm2, %v288_v36, %v266_v32 }
  0xa6   :  { %v246_v38 = vsel %vm244_vm2, %v243_v35, %v220_v31 }
  0xa8   :  { %v272_v34 = vpop.permute.xlu1 %271 }
  0xa9   :  { %v226_v33 = vpop.permute.xlu0 %225  ;;  %v292_v46 = vsel %vm247_vm3, %v290_v41, %v272_v34 }
  0xaa   :  { %v249_v44 = vsel %vm247_vm3, %v246_v38, %v226_v33 }
  0xac   :  { %v278_v42 = vpop.permute.xlu1 %277 }
  0xad   :  { %v232_v39 = vpop.permute.xlu0 %231  ;;  %v294_v51 = vsel %vm44_vm0, %v292_v46, %v278_v42 }
  0xae   :  { %v251_v48 = vsel %vm44_vm0, %v249_v44, %v232_v39 }
  0xb0   :  { %v284_v52 = vpop.permute.xlu1 %283 }
  0xb1   :  { %v238_v49 = vpop.permute.xlu0 %237  ;;  %v296_v56 = vsel %vm252_vm5, %v294_v51, %v284_v52 }
  0xb2   :  { %v254_v54 = vsel %vm252_vm5, %v251_v48, %v238_v49 }
  0xf1   :  { %v2184_v57 = vpop.f32.mrb[0].mxu0 }
  0xf2   :  { %v298_v59 = vmul.f32 %v2184_v57, %v254_v54  ;;  %v1830_v60 = vpop.f32.mrb[0].mxu1  ;;  %v2187_v61 = vpop.f32.mrb[1].mxu0 }
  0xf3   :  { %v300_v62 = vmul.f32 %v1830_v60, %v296_v56  ;;  %v297_v63 = vmul.f32 %v253_v58, %v2187_v61  ;;  %v196_v0 = vpop.f32.mrb[1].mxu1 }
  0xf4   :  { %v299_v2 = vmul.f32 %v295_v1, %v196_v0 }
  0xf5   :  { %v302_v3 = vadd.f32 %v300_v62, %v298_v59 }
  0xf6   :  { %v301_v4 = vadd.f32 %v299_v2, %v297_v63 }
  0xf8   :  { %468 = vrot.lane.b32.xlu1 %v301_v4, %s2052_s4  ;;  %304 = vrot.lane.b32.xlu0 %v301_v4, %s2053_s5 }
  0xfc   :  { %626 = vrot.lane.b32.xlu1 %v301_v4, %s2054_s14  ;;  %628 = vrot.lane.b32.xlu0 %v301_v4, %s2055_s15 }
 0x100   :  { %965 = vrot.lane.b32.xlu1 %v302_v3, %s2053_s5  ;;  %791 = vrot.lane.b32.xlu0 %v301_v4, %s2056_s16 }
 0x104   :  { %1289 = vrot.lane.b32.xlu1 %v302_v3, %s2055_s15  ;;  %1129 = vrot.lane.b32.xlu0 %v302_v3, %s2052_s4 }
 0x108   :  { %1452 = vrot.lane.b32.xlu1 %v302_v3, %s2056_s16  ;;  %1287 = vrot.lane.b32.xlu0 %v302_v3, %s2054_s14 }
 0x16a   :  { %v469_v5 = vpop.permute.xlu1 %468  ;;  %v305_v6 = vpop.permute.xlu0 %304 }
 0x16b   :  { %1832 = vmatpush3.xpose.msk.msra.mxu1 %vm241_vm1, %v305_v6  ;;  %1842 = vmatpush3.xpose.msk.msra.mxu0 %vm241_vm1, %v305_v6 }
 0x16c   :  { %1851 = vmatprep.subr.mxu0 %v2050_v18  ;;  %1836 = vmatprep.subr.mxu1 %v2050_v18 }
 0x16e   :  { %1834 = vmatmul.mubr.msk.f32.vlgmr.msra.gmra.mrb[2].mxu1 %vm241_vm1, %v301_v4  ;;  %1844 = vmatmul.mubr.msk.f32.vlgmr.msra.gmra.mrb[2].mxu0 %vm241_vm1, %v469_v5  ;;  %v629_v7 = vpop.permute.xlu0 %628  ;;  %v627_v8 = vpop.permute.xlu1 %626 }
 0x16f   :  { %1852 = vmatpush3.xpose.msk.msra.mxu0 %vm241_vm1, %v629_v7  ;;  %1853 = vmatprep.mubr.msk.f32.mxu0 %vm2051_vm4, %v2050_v18 }
 0x170   :  { %1861 = vmatprep.subr.mxu0 %v2050_v18  ;;  %1838 = vmatprep.mubr.msk.f32.mxu1 %vm2051_vm4, %v2050_v18 }
 0x172   :  { %1854 = vmatmul.mubr.msk.f32.vlgmr.msra.gmra.mrb[4].mxu0 %vm241_vm1, %v627_v8  ;;  %v792_v9 = vpop.permute.xlu0 %791  ;;  %v966_v10 = vpop.permute.xlu1 %965 }
 0x173   :  { %1862 = vmatpush3.xpose.msk.msra.mxu0 %vm241_vm1, %v629_v7  ;;  %1863 = vmatprep.mubr.msk.f32.mxu0 %vm2051_vm4, %v2050_v18 }
 0x174   :  { %1871 = vmatprep.subr.mxu0 %v2050_v18 }
 0x176   :  { %1864 = vmatmul.mubr.msk.f32.vlgmr.msra.gmra.mrb[6].mxu0 %vm241_vm1, %v792_v9  ;;  %v1130_v11 = vpop.permute.xlu0 %1129  ;;  %v1290_v12 = vpop.permute.xlu1 %1289 }
 0x177   :  { %1872 = vmatpush3.xpose.msk.msra.mxu0 %vm241_vm1, %v966_v10  ;;  %1873 = vmatprep.mubr.msk.f32.mxu0 %vm2051_vm4, %v2050_v18 }
 0x178   :  { %1881 = vmatprep.subr.mxu0 %v2050_v18 }
 0x17a   :  { %1874 = vmatmul.mubr.msk.f32.vlgmr.msra.gmra.mrb[8].mxu0 %vm241_vm1, %v302_v3  ;;  %v1288_v13 = vpop.permute.xlu0 %1287  ;;  %v1453_v14 = vpop.permute.xlu1 %1452 }
 0x17b   :  { %1882 = vmatpush3.xpose.msk.msra.mxu0 %vm241_vm1, %v966_v10  ;;  %1883 = vmatprep.mubr.msk.f32.mxu0 %vm2051_vm4, %v2050_v18 }
 0x17c   :  { %1891 = vmatprep.subr.mxu0 %v2050_v18 }
 0x17e   :  { %1884 = vmatmul.mubr.msk.f32.vlgmr.msra.gmra.mrb[10].mxu0 %vm241_vm1, %v1130_v11 }
 0x17f   :  { %1892 = vmatpush3.xpose.msk.msra.mxu0 %vm241_vm1, %v1290_v12  ;;  %1893 = vmatprep.mubr.msk.f32.mxu0 %vm2051_vm4, %v2050_v18 }
 0x180   :  { %1901 = vmatprep.subr.mxu0 %v2050_v18 }
 0x182   :  { %1894 = vmatmul.mubr.msk.f32.vlgmr.msra.gmra.mrb[12].mxu0 %vm241_vm1, %v1288_v13 }
 0x183   :  { %1902 = vmatpush3.xpose.msk.msra.mxu0 %vm241_vm1, %v1290_v12  ;;  %1903 = vmatprep.mubr.msk.f32.mxu0 %vm2051_vm4, %v2050_v18 }
 0x186   :  { %1904 = vmatmul.mubr.msk.f32.vlgmr.msra.gmra.mrb[14].mxu0 %vm241_vm1, %v1453_v14 }
 0x241   :  { %v376_v15 = vpop.f32.mrb[2].mxu1  ;;  %v538_v16 = vpop.f32.mrb[2].mxu0 }
 0x242   :  { %v1835_v17 = vpop.f32.mrb[3].mxu1  ;;  %v1845_v19 = vpop.f32.mrb[3].mxu0  ;;  %v542_v20 = vsel %vm241_vm1, %v538_v16, -inf  ;;  %v380_v21 = vsel %vm241_vm1, %v376_v15, -inf }
 0x243   :  { %543 = vmax.xlane.f32.xlu1 %v542_v20  ;;  %381 = vmax.xlane.f32.xlu0 %v380_v21 }
 0x245   :  { %v700_v22 = vpop.f32.mrb[4].mxu0 }
 0x246   :  { %v1855_v23 = vpop.f32.mrb[5].mxu0  ;;  %v704_v24 = vsel %vm241_vm1, %v700_v22, -inf }
 0x247   :  { %705 = vmax.xlane.f32.xlu0 %v704_v24 }
 0x249   :  { %v861_v25 = vpop.f32.mrb[6].mxu0 }
 0x24a   :  { %v1865_v26 = vpop.f32.mrb[7].mxu0  ;;  %v865_v27 = vsel %vm241_vm1, %v861_v25, -inf }
 0x24b   :  { %866 = vmax.xlane.f32.xlu0 %v865_v27 }
 0x24d   :  { %v1037_v28 = vpop.f32.mrb[8].mxu0 }
 0x24e   :  { %v1875_v29 = vpop.f32.mrb[9].mxu0  ;;  %v1041_v30 = vsel %vm241_vm1, %v1037_v28, -inf }
 0x24f   :  { %1042 = vmax.xlane.f32.xlu1 %v1041_v30 }
 0x251   :  { %v1199_v31 = vpop.f32.mrb[10].mxu0 }
 0x252   :  { %v1885_v32 = vpop.f32.mrb[11].mxu0  ;;  %v1203_v33 = vsel %vm241_vm1, %v1199_v31, -inf }
 0x253   :  { %1204 = vmax.xlane.f32.xlu0 %v1203_v33 }
 0x255   :  { %v1361_v34 = vpop.f32.mrb[12].mxu0 }
 0x256   :  { %v1895_v35 = vpop.f32.mrb[13].mxu0  ;;  %v1365_v36 = vsel %vm241_vm1, %v1361_v34, -inf }
 0x257   :  { %1366 = vmax.xlane.f32.xlu1 %v1365_v36 }
 0x259   :  { %v1522_v37 = vpop.f32.mrb[14].mxu0 }
 0x25a   :  { %v1905_v38 = vpop.f32.mrb[15].mxu0  ;;  %v1526_v39 = vsel %vm241_vm1, %v1522_v37, -inf }
 0x25b   :  { %1527 = vmax.xlane.f32.xlu0 %v1526_v39 }
 0x268   :  { %715 = vrot.lane.b32.xlu1 %v2187_v61, %s2057_s17 }
 0x271   :  { %392 = vrot.lane.b32.xlu0 %v2187_v61, %s2058_s18 }
 0x2d0   :  { %v544_v40 = vpop.xlane.xlu1 %543  ;;  %v382_v41 = vpop.xlane.xlu0 %381 }
 0x2d1   :  { %v545_v42 = vsub.f32 %v538_v16, %v544_v40  ;;  %v383_v43 = vsub.f32 %v376_v15, %v382_v41 }
 0x2d3   :  { %v546_v44 = vmul.f32 1.442695, %v545_v42  ;;  %v384_v45 = vmul.f32 1.442695, %v383_v43 }
 0x2d4   :  { %v706_v46 = vpop.xlane.xlu0 %705 }
 0x2d5   :  { %1963 = vpow2.f32 %v546_v44  ;;  %v707_v47 = vsub.f32 %v700_v22, %v706_v46 }
 0x2d6   :  { %1965 = vpow2.f32 %v384_v45 }
 0x2d7   :  { %v708_v48 = vmul.f32 1.442695, %v707_v47 }
 0x2d8   :  { %v867_v49 = vpop.xlane.xlu0 %866 }
 0x2d9   :  { %1967 = vpow2.f32 %v708_v48  ;;  %v868_v50 = vsub.f32 %v861_v25, %v867_v49  ;;  %v1625_v49 = vld [vmem:[%s2334_s3] sm:$0xff] }
 0x2db   :  { %v869_v51 = vmul.f32 1.442695, %v868_v50  ;;  %v1626_v50 = vld [vmem:[%s2334_s3 + $0x8] sm:$0xff] }
 0x2dc   :  { %v1043_v52 = vpop.xlane.xlu1 %1042 }
 0x2dd   :  { %1969 = vpow2.f32 %v869_v51  ;;  %v1044_v53 = vsub.f32 %v1037_v28, %v1043_v52 }
 0x2df   :  { %v1964_v54 = vpop.eup %1963  ;;  %v1045_v55 = vmul.f32 1.442695, %v1044_v53  ;;  %v1627_v53 = vld [vmem:[%s2334_s3 + $0x10] sm:$0xff] }
 0x2e0   :  { %v1966_v56 = vpop.eup %1965  ;;  %v1205_v58 = vpop.xlane.xlu0 %1204  ;;  %v548_v59 = vsel %vm241_vm1, %v1964_v54, 0.0 }
 0x2e1   :  { %1971 = vpow2.f32 %v1045_v55  ;;  %v1206_v60 = vsub.f32 %v1199_v31, %v1205_v58  ;;  %549 = vadd.xlane.f32.xlu0 %v548_v59  ;;  %v386_v61 = vsel %vm241_vm1, %v1966_v56, 0.0 }
 0x2e2   :  { %387 = vadd.xlane.f32.xlu1 %v386_v61 }
 0x2e3   :  { %v1968_v62 = vpop.eup %1967  ;;  %v1207_v63 = vmul.f32 1.442695, %v1206_v60 }
 0x2e4   :  { %v1367_v0 = vpop.xlane.xlu1 %1366  ;;  %v710_v1 = vsel %vm241_vm1, %v1968_v62, 0.0 }
 0x2e5   :  { %1973 = vpow2.f32 %v1207_v63  ;;  %v1368_v2 = vsub.f32 %v1361_v34, %v1367_v0 }
 0x2e6   :  { %711 = vadd.xlane.f32.xlu1 %v710_v1 }
 0x2e7   :  { %v1970_v3 = vpop.eup %1969  ;;  %v1369_v4 = vmul.f32 1.442695, %v1368_v2 }
 0x2e8   :  { %v1528_v5 = vpop.xlane.xlu0 %1527  ;;  %v871_v6 = vsel %vm241_vm1, %v1970_v3, 0.0  ;;  %v716_v19 = vpop.permute.xlu1 %715 }
 0x2e9   :  { %1975 = vpow2.f32 %v1369_v4  ;;  %v1529_v7 = vsub.f32 %v1522_v37, %v1528_v5  ;;  %872 = vadd.xlane.f32.xlu0 %v871_v6 }
 0x2eb   :  { %v1972_v8 = vpop.eup %1971  ;;  %v1530_v9 = vmul.f32 1.442695, %v1529_v7 }
 0x2ec   :  { %v393_v10 = vpop.permute.xlu0 %392  ;;  %v1047_v11 = vsel %vm241_vm1, %v1972_v8, 0.0 }
 0x2ed   :  { %1977 = vpow2.f32 %v1530_v9  ;;  %1048 = vadd.xlane.f32.xlu1 %v1047_v11  ;;  %1837 = vmatpush3.msra.mxu1 %v393_v10 }
 0x2ee   :  { %1846 = vmatprep.subr.mxu1 %v2050_v18 }
 0x2ef   :  { %v1974_v12 = vpop.eup %1973 }
 0x2f0   :  { %v1209_v13 = vsel %vm241_vm1, %v1974_v12, 0.0 }
 0x2f1   :  { %1210 = vadd.xlane.f32.xlu0 %v1209_v13 }
 0x2f3   :  { %v2246_v14 = vpop.eup %1975 }
 0x2f4   :  { %v1371_v15 = vsel %vm241_vm1, %v2246_v14, 0.0 }
 0x2f5   :  { %1372 = vadd.xlane.f32.xlu1 %v1371_v15 }
 0x2f7   :  { %v2250_v16 = vpop.eup %1977 }
 0x2f8   :  { %v1532_v17 = vsel %vm241_vm1, %v2250_v16, 0.0 }
 0x2f9   :  { %1533 = vadd.xlane.f32.xlu1 %v1532_v17 }
 0x307   :  { %1053 = vrot.lane.b32.xlu0 %v2184_v57, %s2058_s18 }
 0x30a   :  { %1376 = vrot.lane.b32.xlu1 %v2184_v57, %s2057_s17 }
 0x36e   :  { %v550_v21 = vpop.xlane.xlu0 %549 }
 0x36f   :  { %v388_v20 = vpop.xlane.xlu1 %387 }
 0x370   :  { %1979 = vrcp.f32 %v388_v20 }
 0x371   :  { %1981 = vrcp.f32 %v550_v21 }
 0x373   :  { %v712_v22 = vpop.xlane.xlu1 %711 }
 0x374   :  { %1983 = vrcp.f32 %v712_v22 }
 0x376   :  { %v873_v23 = vpop.xlane.xlu0 %872 }
 0x377   :  { %1985 = vrcp.f32 %v873_v23 }
 0x37a   :  { %v1980_v24 = vpop.eup %1979  ;;  %v1049_v26 = vpop.xlane.xlu1 %1048 }
 0x37b   :  { %v390_v25 = vmul.f32 %v1980_v24, %v1966_v56  ;;  %v1982_v27 = vpop.eup %1981  ;;  %1987 = vrcp.f32 %v1049_v26 }
 0x37c   :  { %v552_v57 = vmul.f32 %v1982_v27, %v1964_v54  ;;  %v1628_v54 = vld [vmem:[%s2334_s3 + $0x18] sm:$0xff]  ;;  %s2059_s3 = smov [#allocation5]  }
 0x37d   :  { %1839 = vmatmul.mubr.msk.f32.vlgmr.msra.gmra.mrb[4].mxu1 %vm241_vm1, %v390_v25  ;;  %v1942_v56 = vpack.c.bf16 %v1628_v54, %v1627_v53  ;;  %s1717_s26 = sshll.u32 %s2059_s3, 4  ;;  %s1718_s26 = int_to_ptr.vmem [resolvable:$true] %s1717_s26 }
 0x37e   :  { %1847 = vmatpush3.msra.mxu1 %v393_v10  ;;  %1848 = vmatprep.mubr.msk.f32.mxu1 %vm2051_vm4, %v2050_v18  ;;  %v1211_v28 = vpop.xlane.xlu0 %1210  ;;  %v1984_v29 = vpop.eup %1983  ;;  %s2017_s27 = scalar_lea.vmem %s1718_s26, 256  ;;  %p2022_p9 = scmp.lt.s32.totalorder %s1718_s26, %s1718_s26 }
 0x37f   :  { %1856 = vmatprep.subr.mxu1 %v2050_v18  ;;  %1989 = vrcp.f32 %v1211_v28  ;;  %v714_v31 = vmul.f32 %v1984_v29, %v1968_v62  ;;  %p2018_p8 = scmp.ne.s32.totalorder %s1718_s26, %s2017_s27  ;;  %p2023_p10 = scmp.lt.s32.totalorder %s2017_s27, %s2017_s27 }
 0x381   :  { %1849 = vmatmul.mubr.msk.f32.vlgmr.msra.gmra.mrb[6].mxu1 %vm241_vm1, %v552_v57  ;;  %v1986_v32 = vpop.eup %1985  ;;  %p2024_p11 = por %p2023_p10, %p2022_p9 }
 0x382   :  { %1857 = vmatpush3.msra.mxu1 %v716_v19  ;;  %v1373_v30 = vpop.xlane.xlu1 %1372  ;;  %1858 = vmatprep.mubr.msk.f32.mxu1 %vm2051_vm4, %v2050_v18  ;;  %v875_v33 = vmul.f32 %v1986_v32, %v1970_v3  ;;  %v1054_v36 = vpop.permute.xlu0 %1053 }
 0x383   :  { %1866 = vmatprep.subr.mxu1 %v2050_v18  ;;  %1991 = vrcp.f32 %v1373_v30  ;;  %p2025_p12 = pnand %p2024_p11, %p2018_p8 }
 0x385   :  { %1859 = vmatmul.mubr.msk.f32.vlgmr.msra.gmra.mrb[8].mxu1 %vm241_vm1, %v714_v31  ;;  %v1988_v35 = vpop.eup %1987 }
 0x386   :  { %1867 = vmatpush3.msra.mxu1 %v716_v19  ;;  %1868 = vmatprep.mubr.msk.f32.mxu1 %vm2051_vm4, %v2050_v18  ;;  %v1534_v34 = vpop.xlane.xlu1 %1533  ;;  %v1051_v37 = vmul.f32 %v1988_v35, %v1972_v8 }
 0x387   :  { %1876 = vmatprep.subr.mxu1 %v2050_v18  ;;  %1993 = vrcp.f32 %v1534_v34 }
 0x389   :  { %1869 = vmatmul.mubr.msk.f32.vlgmr.msra.gmra.mrb[10].mxu1 %vm241_vm1, %v875_v33  ;;  %v1990_v38 = vpop.eup %1989 }
 0x38a   :  { %1877 = vmatpush3.msra.mxu1 %v1054_v36  ;;  %1878 = vmatprep.mubr.msk.f32.mxu1 %vm2051_vm4, %v2050_v18  ;;  %v1213_v39 = vmul.f32 %v1990_v38, %v1974_v12  ;;  %v1377_v41 = vpop.permute.xlu1 %1376 }
 0x38b   :  { %1886 = vmatprep.subr.mxu1 %v2050_v18 }
 0x38d   :  { %1879 = vmatmul.mubr.msk.f32.vlgmr.msra.gmra.mrb[12].mxu1 %vm241_vm1, %v1051_v37  ;;  %v1992_v40 = vpop.eup %1991 }
 0x38e   :  { %1887 = vmatpush3.msra.mxu1 %v1054_v36  ;;  %1888 = vmatprep.mubr.msk.f32.mxu1 %vm2051_vm4, %v2050_v18  ;;  %v1375_v42 = vmul.f32 %v1992_v40, %v2246_v14 }
 0x38f   :  { %1896 = vmatprep.subr.mxu1 %v2050_v18 }
 0x391   :  { %1889 = vmatmul.mubr.msk.f32.vlgmr.msra.gmra.mrb[14].mxu1 %vm241_vm1, %v1213_v39  ;;  %v1994_v43 = vpop.eup %1993 }
 0x392   :  { %1897 = vmatpush3.msra.mxu1 %v1377_v41  ;;  %1898 = vmatprep.mubr.msk.f32.mxu1 %vm2051_vm4, %v2050_v18  ;;  %v1536_v44 = vmul.f32 %v1994_v43, %v2250_v16 }
 0x393   :  { %1906 = vmatprep.subr.mxu1 %v2050_v18 }
 0x395   :  { %1899 = vmatmul.mubr.msk.f32.vlgmr.msra.gmra.mrb[16].mxu1 %vm241_vm1, %v1375_v42 }
 0x396   :  { %1907 = vmatpush3.msra.mxu1 %v1377_v41  ;;  %1908 = vmatprep.mubr.msk.f32.mxu1 %vm2051_vm4, %v2050_v18  ;;  %v1938_v18 = vpack.c.bf16 %v1626_v50, %v1625_v49 }
 0x398   :  { %1939 = vmatprep.subr.bf16.mxu0 %v1938_v18 }
 0x399   :  { %1909 = vmatmul.mubr.msk.f32.vlgmr.msra.gmra.mrb[18].mxu1 %vm241_vm1, %v1536_v44  ;;  %1941 = vmatpush3.bf16.msra.mxu0 %v1938_v18 }
 0x39a   :  { %1943 = vmatprep.subr.bf16.mxu0 %v1942_v56 }
 0x39d   :  { %1945 = vmatpush3.bf16.msra.mxu0 %v1942_v56 }
 0x450   :  { %v464_v45 = vpop.f32.mrb[4].mxu1 }
 0x451   :  { %v1840_v46 = vpop.f32.mrb[5].mxu1 }
 0x454   :  { %v622_v47 = vpop.f32.mrb[6].mxu1 }
 0x455   :  { %950 = vrot.lane.b32.xlu0 %v622_v47, %s2045_s8  ;;  %v1850_v48 = vpop.f32.mrb[7].mxu1 }
 0x458   :  { %v787_v51 = vpop.f32.mrb[8].mxu1 }
 0x459   :  { %954 = vrot.lane.b32.xlu1 %v787_v51, %s2046_s1  ;;  %v1860_v52 = vpop.f32.mrb[9].mxu1 }
 0x45c   :  { %v945_v55 = vpop.f32.mrb[10].mxu1 }
 0x45d   :  { %958 = vrot.lane.b32.xlu1 %v945_v55, %s2047_s29  ;;  %v1870_v58 = vpop.f32.mrb[11].mxu1 }
 0x460   :  { %v1125_v59 = vpop.f32.mrb[12].mxu1 }
 0x461   :  { %v1880_v60 = vpop.f32.mrb[13].mxu1 }
 0x464   :  { %v1283_v61 = vpop.f32.mrb[14].mxu1 }
 0x465   :  { %1611 = vrot.lane.b32.xlu0 %v1283_v61, %s2045_s8  ;;  %v1890_v62 = vpop.f32.mrb[15].mxu1 }
 0x468   :  { %v1448_v63 = vpop.f32.mrb[16].mxu1 }
 0x469   :  { %1615 = vrot.lane.b32.xlu0 %v1448_v63, %s2046_s1  ;;  %v1900_v0 = vpop.f32.mrb[17].mxu1 }
 0x46c   :  { %v1606_v1 = vpop.f32.mrb[18].mxu1 }
 0x46d   :  { %1619 = vrot.lane.b32.xlu1 %v1606_v1, %s2047_s29  ;;  %v1910_v2 = vpop.f32.mrb[19].mxu1 }
 0x4c7   :  { %v951_v3 = vpop.permute.xlu0 %950 }
 0x4c8   :  { %v961_v5 = vsel %vm241_vm1, %v464_v45, %v951_v3 }
 0x4cb   :  { %v955_v4 = vpop.permute.xlu1 %954 }
 0x4cc   :  { %v962_v6 = vsel %vm244_vm2, %v961_v5, %v955_v4 }
 0x4cf   :  { %v959_v7 = vpop.permute.xlu1 %958 }
 0x4d0   :  { %v963_v8 = vsel %vm247_vm3, %v962_v6, %v959_v7 }
 0x4d1   :  { %1919 = vmatprep.mubr.msk.f32.mxu0 %vm44_vm0, %v963_v8 }
 0x4d7   :  { %v1612_v9 = vpop.permute.xlu0 %1611 }
 0x4d8   :  { %v1622_v11 = vsel %vm241_vm1, %v1125_v59, %v1612_v9 }
 0x4db   :  { %v1616_v10 = vpop.permute.xlu0 %1615 }
 0x4dc   :  { %v1623_v12 = vsel %vm244_vm2, %v1622_v11, %v1616_v10 }
 0x4df   :  { %v1620_v13 = vpop.permute.xlu1 %1619 }
 0x4e0   :  { %v1624_v14 = vsel %vm247_vm3, %v1623_v12, %v1620_v13 }
 0x4e1   :  { %1920 = vmatmul.mubr.msk.f32.vlgmr.msra.gmra.mrb[16].mxu0 %vm44_vm0, %v1624_v14 }
 0x5b4   :  { %v1921_v15 = vpop.f32.mrb[16].mxu0 }
 0x5b5   :  { %1711 = vst.msk [vmem:[#allocation5 + $0x8] sm:$0xff] %vm44_vm0, %v1921_v15  ;;  %v1701_v16 = vpop.f32.mrb[17].mxu0 }
 0x5b6   :  { %1710 = vst.msk [vmem:[#allocation5] sm:$0xff] %vm44_vm0, %v1701_v16 }
 0x5b7   :  { %2028 = shalt.err (!%p2025_p12)
}
 0x5b8   :  { %s2029_s28 = scalar_lea.hbm %s2337_s6, 256 }
 0x5b9   :  { %p2030_p13 = scmp.ne.s32.totalorder %s2337_s6, %s2029_s28  ;;  %p2033_p0 = scmp.lt.u32.totalorder %s2029_s28, %s2337_s6 }
 0x5bb   :  { %p2035_p1 = pnand %p2033_p0, %p2030_p13 }
 0x5bd   :  { %2038 = shalt.err (!%p2035_p1)
}
 0x5be   :  { %1723 = dma.vmem_to_hbm [thread:$0]  %s1718_s26, 256, %s2337_s6, [#allocation4], %s2044_s7, %s2044_s7, %s2045_s8  }
 0x5bf   :  { %2041 = dma.done.wait [#allocation4], 256  }
 0x5c0   :  { %2042 = vsyncadd [#allocation4], 4294967040 }
 0x5c1   :  { %1727 = vsyncpa [#allocation3], 1 }
 0x5c2   :  { %1728 = vsyncpa [#allocation4], 1 }

</bundles_post_ra>
